<compile_context>
chip_gen: v6e
topology: v6e:2x2x1
jax: 0.10.0
libtpu: 0.0.40
codegen_flags: <defaults>
</compile_context>

<pallas_src>
import jax
import jax.numpy as jnp
from jax.experimental import pallas as pl
from jax.experimental.pallas import tpu as pltpu


def _freq_attention_kernel(x_ref, w1_ref, b1_ref, w2_ref, b2_ref, o_ref):
    x = x_ref[...]                                                    # (TB, F, T)
    t = x.shape[-1]

    # --- pooling over time (lane-axis reductions). Mean accumulates in f32 so
    #     bf16 inputs with long T match the fp32 PyTorch reference. ---
    mean_pool = jnp.sum(x, axis=-1, dtype=jnp.float32) * (1.0 / t)    # (TB, F) f32
    max_pool = jnp.max(x, axis=-1).astype(jnp.float32)                # (TB, F) f32

    # --- shared MLP, evaluated per pool. No sublane-crossing concat: the
    #     matmuls are tiny (F, H << 128), so running the MLP twice is free
    #     while the concat/split relayout is not. ---
    def mlp(p):
        h = jnp.dot(p, w1_ref[...], preferred_element_type=jnp.float32) + b1_ref[...]
        h = jnp.maximum(h, 0.0)                                       # ReLU
        return jnp.dot(h, w2_ref[...], preferred_element_type=jnp.float32) + b2_ref[...]

    scale = jax.nn.sigmoid(mlp(mean_pool) + mlp(max_pool))            # (TB, F) f32

    # Cast the scale down to the input dtype before the broadcast multiply so
    # the full (TB, F, T) block is never promoted to f32 for the product.
    o_ref[...] = (x * scale.astype(x.dtype)[:, :, None]).astype(o_ref.dtype)


def _vmem_budget():
    """Return (scoped-VMEM ceiling bytes, target x-block bytes) per generation."""
    try:
        cap = pltpu.get_tpu_info().vmem_capacity_bytes
    except Exception:
        cap = 64 << 20  # conservative fallback (assume the smaller v7x VMEM)
    if cap <= (64 << 20):
        # v7x-class: 64 MiB physical -> keep pipeline + temporaries <= ~40 MiB.
        return 40 << 20, 4 << 20
    # v5e / v6e: 128 MiB physical -> bigger blocks amortize per-step overhead.
    return 96 << 20, 12 << 20


def _pick_block_b(B, F, T, itemsize, target_block_bytes, min_steps=4):
    """Largest batch tile near target_block_bytes, while keeping >= min_steps
    grid steps (pipelining; feeds both TensorCores on v7x)."""
    per_row = max(F * T * itemsize, 1)
    tb = max(1, target_block_bytes // per_row)
    if B >= min_steps:
        tb = min(tb, B // min_steps)   # guarantees cdiv(B, tb) >= min_steps
    if tb >= 8:
        tb = (tb // 8) * 8             # sublane-friendly batch tile
    return int(max(1, min(tb, B)))


def freq_attention(x, w1, b1, w2, b2, *, block_b=None, donate_x=True):
    """Pallas Freq_attention forward.

    x : (B, F, T)   (for best store bandwidth, T should be a multiple of 128)
    w1: (H, F)  torch nn.Linear(F, H).weight   (H = F // reduction)
    b1: (H,)    torch nn.Linear(F, H).bias
    w2: (F, H)  torch nn.Linear(H, F).weight
    b2: (F,)    torch nn.Linear(H, F).bias
    """
    B, F, T = x.shape
    H = w1.shape[0]
    assert w1.shape == (H, F), (w1.shape, (H, F))
    assert b1.shape == (H,), (b1.shape, (H,))
    assert w2.shape == (F, H), (w2.shape, (F, H))
    assert b2.shape == (F,), (b2.shape, (F,))

    # Pre-transpose for right-multiplication; biases as 2D rows for VMEM.
    w1t = jnp.asarray(w1).T.astype(jnp.float32)               # (F, H)
    w2t = jnp.asarray(w2).T.astype(jnp.float32)               # (H, F)
    b1r = jnp.asarray(b1).reshape(1, H).astype(jnp.float32)   # (1, H)
    b2r = jnp.asarray(b2).reshape(1, F).astype(jnp.float32)   # (1, F)

    itemsize = x.dtype.itemsize
    vmem_ceiling, target_block_bytes = _vmem_budget()

    if block_b is None:
        block_b = _pick_block_b(B, F, T, itemsize, target_block_bytes)
    block_b = int(min(max(block_b, 1), B))

    weight_bytes = 4 * (F * H + H + H * F + F)

    def _footprint(tb):
        # 2x double-buffered input + 2x double-buffered output + ~2 block-sized
        # in-body temporaries (materialized x value, product before the output
        # cast) + resident weights + slack.
        return 6 * tb * F * T * itemsize + 2 * weight_bytes + (2 << 20)

    # Auto-shrink rather than overrun the per-generation VMEM budget.
    while block_b > 1 and _footprint(block_b) > vmem_ceiling:
        block_b //= 2
    if _footprint(block_b) > vmem_ceiling:
        # TODO(synk): two-pass T-tiled variant (pool/MLP pass accumulating
        # sum/max over T tiles, then a scale-apply pass) for very long T that
        # does not fit VMEM even at block_b=1.
        raise ValueError(
            f"Freq_attention: a single (1, {F}, {T}) block (itemsize={itemsize}) "
            f"exceeds the VMEM budget of {vmem_ceiling} bytes; T-tiled variant "
            f"not implemented.")

    vmem_limit = int(min(max(_footprint(block_b), 8 << 20), vmem_ceiling))
    grid = (pl.cdiv(B, block_b),)

    # Advisory cost: bandwidth-dominated (2*|x| + weights), negligible FLOPs.
    cost = pl.CostEstimate(
        flops=int(8 * B * F * H + 3 * B * F * T),
        transcendentals=int(B * F),
        bytes_accessed=int(2 * B * F * T * itemsize + weight_bytes),
    )

    extra = {}
    if donate_x:
        # Output aliases x (same shape/dtype/index_map): halves peak HBM
        # footprint when the caller donates x; XLA copies otherwise (safe).
        extra["input_output_aliases"] = {0: 0}

    # NOTE: the padded rows of a ragged last batch block (B % block_b != 0) are
    # pooled/MLP'd on whatever data Pallas supplies but discarded on writeback;
    # nothing in this kernel reduces across the batch axis, so this is safe.
    return pl.pallas_call(
        _freq_attention_kernel,
        out_shape=jax.ShapeDtypeStruct((B, F, T), x.dtype),
        grid=grid,
        in_specs=[
            pl.BlockSpec((block_b, F, T), lambda i: (i, 0, 0)),
            pl.BlockSpec((F, H), lambda i: (0, 0)),
            pl.BlockSpec((1, H), lambda i: (0, 0)),
            pl.BlockSpec((H, F), lambda i: (0, 0)),
            pl.BlockSpec((1, F), lambda i: (0, 0)),
        ],
        out_specs=pl.BlockSpec((block_b, F, T), lambda i: (i, 0, 0)),
        compiler_params=pltpu.CompilerParams(
            dimension_semantics=("parallel",),
            vmem_limit_bytes=vmem_limit,
        ),
        cost_estimate=cost,
        **extra,
    )(x, w1t, b1r, w2t, b2r)


def freq_attention_ref(x, w1, b1, w2, b2):
    """Pure-JAX reference matching the PyTorch forward (torch Linear layout)."""
    mean_pool = jnp.mean(x, axis=-1)
    max_pool = jnp.max(x, axis=-1)

    def mlp(p):
        h = jnp.maximum(p @ w1.T + b1, 0.0)
        return h @ w2.T + b2

    scale = jax.nn.sigmoid(mlp(mean_pool) + mlp(max_pool))
    return x * scale[:, :, None]


if __name__ == "__main__":
    def run_case(key, B, F_len, T, reduction, block_b=None,
                 dtype=jnp.float32, atol=1e-5, rtol=1e-5):
        H = max(1, F_len // reduction)
        kx, k1, k2, k3, k4 = jax.random.split(key, 5)
        x = jax.random.normal(kx, (B, F_len, T), dtype=jnp.float32).astype(dtype)
        # torch nn.Linear layouts: weight (out, in), bias (out,)
        w1 = jax.random.normal(k1, (H, F_len), dtype=jnp.float32) * 0.1
        b1 = jax.random.normal(k2, (H,), dtype=jnp.float32) * 0.1
        w2 = jax.random.normal(k3, (F_len, H), dtype=jnp.float32) * 0.1
        b2 = jax.random.normal(k4, (F_len,), dtype=jnp.float32) * 0.1

        # Compute the reference BEFORE the kernel call (the kernel output may
        # alias x when the caller donates it).
        ref = jax.block_until_ready(
            freq_attention_ref(x.astype(jnp.float32), w1, b1, w2, b2))
        out = jax.block_until_ready(
            freq_attention(x, w1, b1, w2, b2, block_b=block_b))
        assert out.shape == x.shape and out.dtype == x.dtype
        out_f = out.astype(jnp.float32)
        err = jnp.max(jnp.abs(out_f - ref))
        assert jnp.allclose(out_f, ref, atol=atol, rtol=rtol), \
            f"mismatch, max abs err {err}"

    key = jax.random.PRNGKey(0)
    k0, k1, k2 = jax.random.split(key, 3)

    # Case 1: shapes consistent with the module (B, freq_len, T); block_b=1 so
    # the kernel runs a 2-step pipelined grid over the batch axis.
    run_case(k0, B=2, F_len=32, T=16, reduction=8, block_b=1)

    # Case 2: non-divisible batch tiling (B=3, block_b=2 -> padded last block)
    # with a lane-dense T (multiple of 128) to exercise unmasked stores.
    run_case(k1, B=3, F_len=40, T=128, reduction=8, block_b=2)

    # Case 3: bf16 input, auto block_b (exercises min-steps grid logic, the f32
    # mean accumulation, and the in-dtype broadcast multiply).
    run_case(k2, B=4, F_len=32, T=128, reduction=8, block_b=None,
             dtype=jnp.bfloat16, atol=8e-2, rtol=5e-2)

    print("KERNEL_OK")
</pallas_src>

<mosaic_0001>
module attributes {stable_mosaic.version = 11 : i64} {
  func.func @_freq_attention_kernel(%arg0: i32, %arg1: memref<1x32x16xf32, #tpu.memory_space<vmem>>, %arg2: memref<32x4xf32, #tpu.memory_space<vmem>>, %arg3: memref<1x4xf32, #tpu.memory_space<vmem>>, %arg4: memref<4x32xf32, #tpu.memory_space<vmem>>, %arg5: memref<1x32xf32, #tpu.memory_space<vmem>>, %arg6: memref<1x32x16xf32, #tpu.memory_space<vmem>>) attributes {dimension_semantics = [#tpu.dimension_semantics<parallel>], iteration_bounds = array<i64: 2>, scalar_prefetch = 0 : i64, scratch_operands = 0 : i64, tpu.core_type = #tpu.core_type<tc>, window_params = [{transform_indices = @transform_0, window_bounds = array<i64: 1, 32, 16>}, {pipeline_mode = #tpu.pipeline_mode<synchronous>, transform_indices = @transform_1, window_bounds = array<i64: 32, 4>}, {pipeline_mode = #tpu.pipeline_mode<synchronous>, transform_indices = @transform_2, window_bounds = array<i64: 1, 4>}, {pipeline_mode = #tpu.pipeline_mode<synchronous>, transform_indices = @transform_3, window_bounds = array<i64: 4, 32>}, {pipeline_mode = #tpu.pipeline_mode<synchronous>, transform_indices = @transform_4, window_bounds = array<i64: 1, 32>}, {transform_indices = @transform_5, window_bounds = array<i64: 1, 32, 16>}]} {
    %c0 = arith.constant 0 : index
    %c0_0 = arith.constant 0 : index
    %c0_1 = arith.constant 0 : index
    %0 = vector.load %arg1[%c0, %c0_0, %c0_1] : memref<1x32x16xf32, #tpu.memory_space<vmem>>, vector<1x32x16xf32>
    %cst = arith.constant dense<0.000000e+00> : vector<1x32xf32>
    %1 = vector.multi_reduction <add>, %0, %cst [2] : vector<1x32x16xf32> to vector<1x32xf32>
    %cst_2 = arith.constant 6.250000e-02 : f32
    %2 = vector.broadcast %cst_2 : f32 to vector<1x32xf32>
    %3 = arith.mulf %1, %2 : vector<1x32xf32>
    %cst_3 = arith.constant dense<0xFF800000> : vector<1x32xf32>
    %4 = vector.multi_reduction <maximumf>, %0, %cst_3 [2] : vector<1x32x16xf32> to vector<1x32xf32>
    %c0_4 = arith.constant 0 : index
    %c0_5 = arith.constant 0 : index
    %5 = vector.load %arg2[%c0_4, %c0_5] : memref<32x4xf32, #tpu.memory_space<vmem>>, vector<32x4xf32>
    %cst_6 = arith.constant dense<0.000000e+00> : vector<1x4xf32>
    %6 = tpu.matmul %3, %5, %cst_6 {dimension_numbers = #tpu.dot_dimension_numbers<[1], [0], [0], [1], [0, 0, 1, 1], [], []>} : vector<1x32xf32>, vector<32x4xf32>, vector<1x4xf32> -> vector<1x4xf32>
    %c0_7 = arith.constant 0 : index
    %c0_8 = arith.constant 0 : index
    %7 = vector.load %arg3[%c0_7, %c0_8] : memref<1x4xf32, #tpu.memory_space<vmem>>, vector<1x4xf32>
    %8 = arith.addf %6, %7 : vector<1x4xf32>
    %cst_9 = arith.constant 0.000000e+00 : f32
    %9 = vector.broadcast %cst_9 : f32 to vector<1x4xf32>
    %10 = arith.maximumf %8, %9 : vector<1x4xf32>
    %c0_10 = arith.constant 0 : index
    %c0_11 = arith.constant 0 : index
    %11 = vector.load %arg4[%c0_10, %c0_11] : memref<4x32xf32, #tpu.memory_space<vmem>>, vector<4x32xf32>
    %cst_12 = arith.constant dense<0.000000e+00> : vector<1x32xf32>
    %12 = tpu.matmul %10, %11, %cst_12 {dimension_numbers = #tpu.dot_dimension_numbers<[1], [0], [0], [1], [0, 0, 1, 1], [], []>} : vector<1x4xf32>, vector<4x32xf32>, vector<1x32xf32> -> vector<1x32xf32>
    %c0_13 = arith.constant 0 : index
    %c0_14 = arith.constant 0 : index
    %13 = vector.load %arg5[%c0_13, %c0_14] : memref<1x32xf32, #tpu.memory_space<vmem>>, vector<1x32xf32>
    %14 = arith.addf %12, %13 : vector<1x32xf32>
    %c0_15 = arith.constant 0 : index
    %c0_16 = arith.constant 0 : index
    %15 = vector.load %arg2[%c0_15, %c0_16] : memref<32x4xf32, #tpu.memory_space<vmem>>, vector<32x4xf32>
    %cst_17 = arith.constant dense<0.000000e+00> : vector<1x4xf32>
    %16 = tpu.matmul %4, %15, %cst_17 {dimension_numbers = #tpu.dot_dimension_numbers<[1], [0], [0], [1], [0, 0, 1, 1], [], []>} : vector<1x32xf32>, vector<32x4xf32>, vector<1x4xf32> -> vector<1x4xf32>
    %c0_18 = arith.constant 0 : index
    %c0_19 = arith.constant 0 : index
    %17 = vector.load %arg3[%c0_18, %c0_19] : memref<1x4xf32, #tpu.memory_space<vmem>>, vector<1x4xf32>
    %18 = arith.addf %16, %17 : vector<1x4xf32>
    %cst_20 = arith.constant 0.000000e+00 : f32
    %19 = vector.broadcast %cst_20 : f32 to vector<1x4xf32>
    %20 = arith.maximumf %18, %19 : vector<1x4xf32>
    %c0_21 = arith.constant 0 : index
    %c0_22 = arith.constant 0 : index
    %21 = vector.load %arg4[%c0_21, %c0_22] : memref<4x32xf32, #tpu.memory_space<vmem>>, vector<4x32xf32>
    %cst_23 = arith.constant dense<0.000000e+00> : vector<1x32xf32>
    %22 = tpu.matmul %20, %21, %cst_23 {dimension_numbers = #tpu.dot_dimension_numbers<[1], [0], [0], [1], [0, 0, 1, 1], [], []>} : vector<1x4xf32>, vector<4x32xf32>, vector<1x32xf32> -> vector<1x32xf32>
    %c0_24 = arith.constant 0 : index
    %c0_25 = arith.constant 0 : index
    %23 = vector.load %arg5[%c0_24, %c0_25] : memref<1x32xf32, #tpu.memory_space<vmem>>, vector<1x32xf32>
    %24 = arith.addf %22, %23 : vector<1x32xf32>
    %25 = arith.addf %14, %24 : vector<1x32xf32>
    %26 = arith.negf %25 : vector<1x32xf32>
    %27 = math.exp %26 : vector<1x32xf32>
    %cst_26 = arith.constant 1.000000e+00 : f32
    %28 = vector.broadcast %cst_26 : f32 to vector<1x32xf32>
    %29 = arith.addf %28, %27 : vector<1x32xf32>
    %30 = arith.divf %28, %29 : vector<1x32xf32>
    %31 = vector.shape_cast %30 : vector<1x32xf32> to vector<1x32x1xf32>
    %32 = vector.broadcast %31 : vector<1x32x1xf32> to vector<1x32x16xf32>
    %33 = arith.mulf %0, %32 : vector<1x32x16xf32>
    %c0_27 = arith.constant 0 : index
    %c0_28 = arith.constant 0 : index
    %c0_29 = arith.constant 0 : index
    %34 = vector.load %arg6[%c0_27, %c0_28, %c0_29] : memref<1x32x16xf32, #tpu.memory_space<vmem>>, vector<1x32x16xf32>
    tpu.vector_store %arg6[%c0_27, %c0_28, %c0_29], %33 {strides = array<i32>} : memref<1x32x16xf32, #tpu.memory_space<vmem>>, vector<1x32x16xf32>,
    return
  }
  func.func @transform_0(%arg0: i32) -> (i32, i32, i32) {
    %c0_i32 = arith.constant 0 : i32
    %c0_i32_0 = arith.constant 0 : i32
    %c0_i32_1 = arith.constant 0 : i32
    return %arg0, %c0_i32, %c0_i32_0 : i32, i32, i32
  }
  func.func @transform_1(%arg0: i32) -> (i32, i32) {
    %c0_i32 = arith.constant 0 : i32
    %c0_i32_0 = arith.constant 0 : i32
    %c0_i32_1 = arith.constant 0 : i32
    return %c0_i32, %c0_i32_0 : i32, i32
  }
  func.func @transform_2(%arg0: i32) -> (i32, i32) {
    %c0_i32 = arith.constant 0 : i32
    %c0_i32_0 = arith.constant 0 : i32
    %c0_i32_1 = arith.constant 0 : i32
    return %c0_i32, %c0_i32_0 : i32, i32
  }
  func.func @transform_3(%arg0: i32) -> (i32, i32) {
    %c0_i32 = arith.constant 0 : i32
    %c0_i32_0 = arith.constant 0 : i32
    %c0_i32_1 = arith.constant 0 : i32
    return %c0_i32, %c0_i32_0 : i32, i32
  }
  func.func @transform_4(%arg0: i32) -> (i32, i32) {
    %c0_i32 = arith.constant 0 : i32
    %c0_i32_0 = arith.constant 0 : i32
    %c0_i32_1 = arith.constant 0 : i32
    return %c0_i32, %c0_i32_0 : i32, i32
  }
  func.func @transform_5(%arg0: i32) -> (i32, i32, i32) {
    %c0_i32 = arith.constant 0 : i32
    %c0_i32_0 = arith.constant 0 : i32
    %c0_i32_1 = arith.constant 0 : i32
    return %arg0, %c0_i32, %c0_i32_0 : i32, i32, i32
  }
}

</mosaic_0001>

<bundles_post_ra>
// kernel: tpu_custom_call.1
= control target key start
LH: loop header
LB: loop body
LE: loop exit
PB: predicated region body
PF: predicated region fallthrough
CT: control target
= control target key end

     0   :  { %s826_s18 = smov 0   ;;  %s954_s0 = inlined_call_operand.vmem [shape: f32[2,32,16], index: 0, kind: input, shape index: {}, may-alias: {0,5}]   ;;  %s955_s1 = inlined_call_operand.vmem [shape: f32[32,4], index: 1, kind: input, shape index: {}]   ;;  %s956_s2 = inlined_call_operand.vmem [shape: f32[1,4], index: 2, kind: input, shape index: {}]   ;;  %s957_s3 = inlined_call_operand.vmem [shape: f32[4,32], index: 3, kind: input, shape index: {}]   ;;  %s958_s4 = inlined_call_operand.vmem [shape: f32[1,32], index: 4, kind: input, shape index: {}]   ;;  %s959_s5 = inlined_call_operand.vmem [shape: f32[2,32,16], index: 5, kind: output, shape index: {}, may-alias: {0,5}]  }
   0x1 LB: > { %s706_s19 = sadd.s32 4294967295, %s792_s18   ;;  %p710_p0 = scmp.ge.s32.totalorder %s792_s18, 1  ;;  %s792_s18 = sphi %s826_s18, %s15_s18  }
   0x2   : > { %p187_p1 = scmp.lt.s32.totalorder %s792_s18, 3 }
   0x4   : > { %p188_p2 = pnand %p710_p0, %p187_p1 }
   0x5   : > { %p215_p3 = scmp.lt.s32.totalorder (!%p188_p2), %s706_s19, 1 }
   0x6   : > { %191 = sbr.rel (%p188_p2) target bundleno = 924 (0x39c), region = 40 }
   0xb   : > { %s961_s19 = smov (!%p215_p3, %s706_s19), 1  ;;  %vm229_vm0 = vcmask 130048   ;;  %v794_v8 = vmov 0.0   ;;  %v862_v9 = vld [vmem:[%s955_s1 + $0x18] sm:$0xff]  ;;  %v870_v10 = vld [vmem:[%s955_s1 + $0x10] sm:$0xff]  ;;  %v877_v11 = vld [vmem:[%s955_s1 + $0x8] sm:$0xff]  ;;  %v267_v17 = vlaneseq }
   0xc   : > { %s724_s20 = sshll.u32 %s961_s19, 5  ;;  %740 = vmatprep.subr.mxu0 %v794_v8  ;;  %751 = vmatprep.subr.mxu1 %v794_v8  ;;  %v883_v12 = vld [vmem:[%s955_s1] sm:$0xff]  ;;  %vm795_vm1 = vmmov 0   ;;  %vm278_vm2 = vcmask 130112   ;;  %vm285_vm3 = vcmask 195712   ;;  %vm292_vm4 = vcmask 261312  }
   0xd   : > { %s219_s23 = scalar_lea.vmem %s954_s0, %s724_s20  ;;  %741 = vmatpush3.msra.mxu0 %v862_v9  ;;  %748 = vmatprep.mubr.msk.f32.mxu0 %vm795_vm1, %v794_v8  ;;  %v268_v18 = vand.u32 127, %v267_v17  ;;  %v900_v19 = vshrl.u32 %v267_v17, 7  ;;  %vm294_vm5 = vcmask 261120   ;;  %v368_v42 = vld [vmem:[%s957_s3] sm:$0xf]  ;;  %vm374_vm6 = vcmask 1043456   ;;  %s224_s15 = scalar_lea.vmem %s959_s5, %s724_s20 }
   0xe   : > { %v842_v0 = vld [vmem:[%s219_s23] sm:$0xff]  ;;  %v844_v1 = vld [vmem:[%s219_s23 + $0x10] sm:$0xff]  ;;  %v846_v2 = vld [vmem:[%s219_s23 + $0x8] sm:$0xff]  ;;  %742 = vmatprep.subr.mxu0 %v794_v8  ;;  %753 = vmatprep.mubr.msk.f32.mxu1 %vm795_vm1, %v794_v8  ;;  %vm370_vm7 = vcmask 31744  }
   0xf   : > { %v230_v3 = vsel %vm229_vm0, %v842_v0, 0.0  ;;  %v236_v4 = vsel %vm229_vm0, %v844_v1, 0.0  ;;  %v852_v5 = vld [vmem:[%s219_s23 + $0x18] sm:$0xff]  ;;  %v233_v6 = vsel %vm229_vm0, %v846_v2, 0.0  ;;  %743 = vmatpush3.msra.mxu0 %v870_v10  ;;  %v246_v13 = vsel %vm229_vm0, %v842_v0, -inf  ;;  %752 = vmatpush3.msk.msra.mxu1 %vm374_vm6, %v368_v42 }
  0x10   : > { %231 = vadd.xlane.f32.xlu0 %v230_v3  ;;  %237 = vadd.xlane.f32.xlu1 %v236_v4  ;;  %v239_v7 = vsel %vm229_vm0, %v852_v5, 0.0  ;;  %v249_v14 = vsel %vm229_vm0, %v846_v2, -inf  ;;  %v252_v15 = vsel %vm229_vm0, %v844_v1, -inf  ;;  %v255_v16 = vsel %vm229_vm0, %v852_v5, -inf  ;;  %v262_v44 = vld [vmem:[%s956_s2] sm:$0x1] }
  0x11   : > { %744 = vmatprep.subr.mxu0 %v794_v8  ;;  %v273_v20 = vadd.s32 4294967288, %v268_v18  ;;  %v287_v21 = vadd.s32 4294967272, %v268_v18  ;;  %v280_v23 = vadd.s32 4294967280, %v268_v18  ;;  %v271_v25 = vsub.s32 %v268_v18, %v900_v19  ;;  %756 = vmatprep.subr.mxu1 %v794_v8  ;;  %v369_v4 = vld [vmem:[%s958_s4] sm:$0x1] }
  0x12   : > { %745 = vmatpush3.msra.mxu0 %v877_v11 }
  0x13   : > { %746 = vmatprep.subr.mxu0 %v794_v8  ;;  %v276_v27 = vsub.s32 %v273_v20, %v900_v19  ;;  %v290_v28 = vsub.s32 %v287_v21, %v900_v19  ;;  %v283_v29 = vsub.s32 %v280_v23, %v900_v19 }
  0x14   : > { %234 = vadd.xlane.f32.xlu0 %v233_v6  ;;  %240 = vadd.xlane.f32.xlu1 %v239_v7 }
  0x15   : > { %747 = vmatpush3.msra.mxu0 %v883_v12 }
  0x16   : > { %767 = vmatprep.subr.mxu0 %v794_v8 }
  0x18   : > { %247 = vmax.xlane.f32.xlu0 %v246_v13  ;;  %250 = vmax.xlane.f32.xlu1 %v249_v14  ;;  %v626_v14 = vsub.s32 0, %v900_v19 }
  0x1c   : > { %253 = vmax.xlane.f32.xlu0 %v252_v15  ;;  %256 = vmax.xlane.f32.xlu1 %v255_v16 }
  0x99   : > { %v232_v22 = vpop.xlane.xlu0 %231  ;;  %v238_v24 = vpop.xlane.xlu1 %237 }
  0x9a   : > { %v242_v26 = vmul.f32 0.0625, %v232_v22  ;;  %v244_v30 = vmul.f32 0.0625, %v238_v24 }
  0x9c   : > { %v272_v35 = vrot.slane %v242_v26, %v271_v25  ;;  %v284_v38 = vrot.slane %v244_v30, %v283_v29 }
  0x9d   : > { %v235_v31 = vpop.xlane.xlu0 %234  ;;  %v241_v32 = vpop.xlane.xlu1 %240 }
  0x9e   : > { %v243_v33 = vmul.f32 0.0625, %v235_v31  ;;  %v245_v34 = vmul.f32 0.0625, %v241_v32 }
  0xa0   : > { %v277_v36 = vrot.slane %v243_v33, %v276_v27  ;;  %v291_v37 = vrot.slane %v245_v34, %v290_v28 }
  0xa1   : > { %v248_v43 = vpop.xlane.xlu0 %247  ;;  %v251_v45 = vpop.xlane.xlu1 %250 }
  0xa2   : > { %v279_v39 = vsel %vm278_vm2, %v277_v36, %v272_v35  ;;  %v455_v48 = vrot.slane %v248_v43, %v271_v25  ;;  %v459_v49 = vrot.slane %v251_v45, %v276_v27 }
  0xa3   : > { %v286_v40 = vsel %vm285_vm3, %v284_v38, %v279_v39 }
  0xa4   : > { %v293_v41 = vsel %vm292_vm4, %v291_v37, %v286_v40  ;;  %v460_v55 = vsel %vm278_vm2, %v459_v49, %v455_v48 }
  0xa5   : > { %749 = vmatmul.mubr.msk.f32.vlgmr.msra.gmra.mxu0 %vm294_vm5, %v293_v41  ;;  %v254_v51 = vpop.xlane.xlu0 %253  ;;  %v257_v54 = vpop.xlane.xlu1 %256 }
  0xa6   : > { %769 = vmatprep.mubr.msk.f32.mxu0 %vm795_vm1, %v794_v8  ;;  %768 = vmatpush3.msk.msra.mxu0 %vm374_vm6, %v368_v42  ;;  %v464_v53 = vrot.slane %v254_v51, %v283_v29  ;;  %v469_v56 = vrot.slane %v257_v54, %v290_v28 }
  0xa8   : > { %v465_v57 = vsel %vm285_vm3, %v464_v53, %v460_v55 }
  0xa9   : > { %v470_v58 = vsel %vm292_vm4, %v469_v56, %v465_v57 }
 0x165   : > { %v363_v46 = vpop.f32.mrf.mxu0 }
 0x166   : > { %v364_v47 = vadd.f32 %v363_v46, %v262_v44 }
 0x167   : > { %v750_v50 = vpop.f32.mrf.mxu0 }
 0x168   : > { %v367_v52 = vmax.f32 %v364_v47, 0.0 }
 0x16a   : > { %754 = vmatmul.mubr.msk.f32.vlgmr.msra.gmra.mxu1 %vm370_vm7, %v367_v52 }
 0x16b   : > { %757 = vmatpush3.msra.mxu1 %v862_v9  ;;  %764 = vmatprep.mubr.msk.f32.mxu1 %vm795_vm1, %v794_v8 }
 0x16c   : > { %758 = vmatprep.subr.mxu1 %v794_v8 }
 0x16d   : > { %759 = vmatpush3.msra.mxu1 %v870_v10 }
 0x16e   : > { %760 = vmatprep.subr.mxu1 %v794_v8 }
 0x16f   : > { %761 = vmatpush3.msra.mxu1 %v877_v11 }
 0x170   : > { %762 = vmatprep.subr.mxu1 %v794_v8 }
 0x171   : > { %763 = vmatpush3.msra.mxu1 %v883_v12 }
 0x172   : > { %765 = vmatmul.mubr.msk.f32.vlgmr.msra.gmra.mxu1 %vm294_vm5, %v470_v58 }
 0x22a   : > { %v444_v59 = vpop.f32.mrf.mxu1 }
 0x22b   : > { %v445_v7 = vadd.f32 %v444_v59, %v369_v4 }
 0x22c   : > { %v755_v60 = vpop.f32.mrf.mxu1 }
 0x232   : > { %v539_v61 = vpop.f32.mrf.mxu1 }
 0x233   : > { %v540_v62 = vadd.f32 %v539_v61, %v262_v44 }
 0x234   : > { %v766_v63 = vpop.f32.mrf.mxu1 }
 0x235   : > { %v543_v3 = vmax.f32 %v540_v62, 0.0 }
 0x237   : > { %770 = vmatmul.mubr.msk.f32.vlgmr.msra.gmra.mxu0 %vm370_vm7, %v543_v3 }
 0x2f7   : > { %v613_v6 = vpop.f32.mrf.mxu0 }
 0x2f8   : > { %v614_v8 = vadd.f32 %v613_v6, %v369_v4 }
 0x2f9   : > { %v771_v9 = vpop.f32.mrf.mxu0 }
 0x2fa   : > { %v617_v10 = vadd.f32 %v614_v8, %v445_v7 }
 0x2fc   : > { %v721_v11 = vmul.f32 -1.442695, %v617_v10 }
 0x2fe   : > { %782 = vpow2.f32 %v721_v11 }
 0x30b   : > { %v783_v12 = vpop.eup %782 }
 0x30c   : > { %v621_v13 = vadd.f32 1.0, %v783_v12 }
 0x30e   : > { %784 = vrcp.f32 %v621_v13 }
 0x31b   : > { %v785_v15 = vpop.eup %784 }
 0x31c   : > { %v627_v16 = vrot.slane %v785_v15, %v626_v14 }
 0x31e   : > { %633 = vbcast.lane.b32.xlu1 %v627_v16, 264  ;;  %629 = vbcast.lane.b32.xlu0 %v627_v16, 256 }
 0x322   : > { %637 = vbcast.lane.b32.xlu1 %v627_v16, 272 }
 0x326   : > { %641 = vbcast.lane.b32.xlu1 %v627_v16, 280 }
 0x390   : > { %v634_v17 = vpop.permute.xlu1 %633  ;;  %v630_v18 = vpop.permute.xlu0 %629 }
 0x391   : > { %v644_v20 = vmul.f32 %v634_v17, %v846_v2  ;;  %v643_v21 = vmul.f32 %v630_v18, %v842_v0 }
 0x393   : > { %648 = vst.msk [vmem:[%s224_s15 + $0x8] sm:$0xff] %vm229_vm0, %v644_v20  ;;  %647 = vst.msk [vmem:[%s224_s15] sm:$0xff] %vm229_vm0, %v643_v21 }
 0x394   : > { %v638_v19 = vpop.permute.xlu1 %637 }
 0x395   : > { %v645_v22 = vmul.f32 %v638_v19, %v844_v1 }
 0x397   : > { %649 = vst.msk [vmem:[%s224_s15 + $0x10] sm:$0xff] %vm229_vm0, %v645_v22 }
 0x398   : > { %v642_v23 = vpop.permute.xlu1 %641 }
 0x399   : > { %v646_v24 = vmul.f32 %v642_v23, %v852_v5 }
 0x39b   : > { %650 = vst.msk [vmem:[%s224_s15 + $0x18] sm:$0xff] %vm229_vm0, %v646_v24 }
 0x39c PF: > { %s15_s18 = sadd.s32 1, %s792_s18  }
 0x39d   : > { %p12_p4 = scmp.ge.s32.totalorder %s15_s18, 4  }
 0x39f   :  { %14 = sbr.rel (!%p12_p4) target bundleno = 1 (0x1), region = 70 }

</bundles_post_ra>
